<compile_context>
chip_gen: v7x
topology: tpu7x:2x2x1
jax: 0.10.0
libtpu: 0.0.40
codegen_flags: <defaults>
</compile_context>

<pallas_src>
import functools

import jax
import jax.numpy as jnp
from jax import lax
from jax.experimental import pallas as pl
from jax.experimental.pallas import tpu as pltpu

_SUBLANE = 8    # f32 sublane count
_LANE = 128     # lane count


def _round_up(x, m):
    return ((x + m - 1) // m) * m


# ---------------------------------------------------------------------------
# Fused kernel: surrogate attention log_ps -> logits head, plus value branch.
# ---------------------------------------------------------------------------
def _fused_forward_kernel(obs_ref, wa_ref, b12_ref, w2_ref,
                          wl_ref, blv_ref, wv_ref, out_ref,
                          *, graph_size, value_col):
    # One obs-shared matmul: [Bb, D] @ [D, G+H]  (w_embed and w1 packed).
    s = jnp.dot(obs_ref[...], wa_ref[...], preferred_element_type=jnp.float32)
    scores = s[:, :graph_size]        # surrogate attention scores  [Bb, G]
    pre_v = s[:, graph_size:]         # value-branch layer-1 preact [Bb, H]

    # self._features = log_ps (stays in vregs; no HBM round-trip).
    m = jnp.max(scores, axis=-1, keepdims=True)
    e = jnp.exp(scores - m)
    lse = jnp.log(jnp.sum(e, axis=-1, keepdims=True)) + m
    log_ps = scores - lse

    # Separate value branch: tanh MLP, then the [H,1] head as a VPU/XLU
    # reduction (broadcast-mul + lane sum) instead of an MXU pass.
    h = jnp.tanh(pre_v + b12_ref[0:1, :])
    h = jnp.tanh(jnp.dot(h, w2_ref[...], preferred_element_type=jnp.float32)
                 + b12_ref[1:2, :])
    v = jnp.sum(h * wv_ref[...], axis=-1, keepdims=True)      # [Bb, 1]

    # Lane-dense output slab: cols [0:NOUT) = logits, col NOUT = value.
    # wl_ref is zero-padded past NOUT and blv_ref already carries bv at
    # column NOUT, so adding the value column on top is exact.
    slab = (jnp.dot(log_ps, wl_ref[...], preferred_element_type=jnp.float32)
            + blv_ref[...])
    col = lax.broadcasted_iota(jnp.int32, slab.shape, 1)
    out_ref[...] = slab + jnp.where(col == value_col, v, 0.0)


# ---------------------------------------------------------------------------
# Wrapper
# ---------------------------------------------------------------------------
def altr_policy_forward(obs, w_embed, wl, bl, w1, b1, w2, b2, wv, bv):
    """Returns (logits [B, num_outputs], value [B])."""
    B, D = obs.shape
    G = w_embed.shape[1]
    H = w1.shape[1]
    NOUT = wl.shape[1]
    slab = _round_up(max(NOUT + 1, _LANE), _LANE)   # lane-dense output width

    # Parameter packing (cheap; in a real deployment this is done once).
    wa = jnp.concatenate([w_embed, w1], axis=1)                 # [D, G+H]
    b12 = jnp.concatenate([b1, b2], axis=0)                     # [2, H]
    wl_pad = jnp.zeros((G, slab), jnp.float32).at[:, :NOUT].set(wl)
    blv = jnp.zeros((1, slab), jnp.float32)
    blv = blv.at[0, :NOUT].set(bl[0]).at[0, NOUT].set(bv[0, 0])  # bv folded in
    wv_row = wv.reshape(1, H)

    # Pad batch to a sublane multiple; block it for a parallel grid.
    block_b = min(_round_up(B, _SUBLANE), 256)
    b_pad = _round_up(B, block_b)
    obs_p = jnp.pad(obs, ((0, b_pad - B), (0, 0)))

    kernel = functools.partial(_fused_forward_kernel,
                               graph_size=G, value_col=NOUT)
    out = pl.pallas_call(
        kernel,
        out_shape=jax.ShapeDtypeStruct((b_pad, slab), jnp.float32),
        grid=(b_pad // block_b,),
        in_specs=[
            pl.BlockSpec((block_b, D), lambda i: (i, 0)),   # obs (streamed)
            pl.BlockSpec((D, G + H), lambda i: (0, 0)),     # packed W_a
            pl.BlockSpec((2, H), lambda i: (0, 0)),          # b1 | b2
            pl.BlockSpec((H, H), lambda i: (0, 0)),          # w2
            pl.BlockSpec((G, slab), lambda i: (0, 0)),       # wl (lane-padded)
            pl.BlockSpec((1, slab), lambda i: (0, 0)),       # bl + bv
            pl.BlockSpec((1, H), lambda i: (0, 0)),          # wv as a row
        ],
        out_specs=pl.BlockSpec((block_b, slab), lambda i: (i, 0)),
        compiler_params=pltpu.CompilerParams(
            dimension_semantics=("parallel",)),
    )(obs_p, wa, b12, w2, wl_pad, blv, wv_row)

    logits = out[:B, :NOUT]
    value = out[:B, NOUT]
    return logits, value


# ---------------------------------------------------------------------------
# Deterministic parameter init (normc_initializer semantics)
# ---------------------------------------------------------------------------
def normc_init(key, in_dim, out_dim, std=1.0):
    w = jax.random.normal(key, (in_dim, out_dim), jnp.float32)
    return w * std / jnp.sqrt(jnp.sum(w * w, axis=0, keepdims=True))


# ---------------------------------------------------------------------------
def _reference(obs, w_embed, wl, bl, w1, b1, w2, b2, wv, bv):
    scores = obs @ w_embed
    logp = scores - jax.scipy.special.logsumexp(scores, axis=-1, keepdims=True)
    logits = logp @ wl + bl
    h = jnp.tanh(obs @ w1 + b1)
    h = jnp.tanh(h @ w2 + b2)
    value = (h @ wv + bv)[:, 0]
    return logits, value


if __name__ == "__main__":
    # shapes consistent with the module:
    #   batch B=2, obs_dim=32, graph_size G=32, num_outputs=15, hiddens=[32,32]
    B, OBS, G, NOUT, H = 2, 32, 32, 15, 32

    key = jax.random.PRNGKey(0)
    k_obs, k_emb, k_l, k_1, k_2, k_v = jax.random.split(key, 6)

    obs = jax.random.normal(k_obs, (B, OBS), jnp.float32)       # obs_flat

    # surrogate attention embedding
    w_embed = normc_init(k_emb, OBS, G, 1.0)
    # self._logits = SlimFC(graph_size -> num_outputs, normc(0.01), no act)
    wl = normc_init(k_l, G, NOUT, 0.01)
    bl = jnp.zeros((1, NOUT), jnp.float32)
    # self._value_branch_separate = [SlimFC(obs->H, tanh), SlimFC(H->H, tanh)]
    w1 = normc_init(k_1, OBS, H, 1.0)
    b1 = jnp.zeros((1, H), jnp.float32)
    w2 = normc_init(k_2, H, H, 1.0)
    b2 = jnp.zeros((1, H), jnp.float32)
    # self._value_branch = SlimFC(H -> 1, normc(0.01), no act)
    wv = normc_init(k_v, H, 1, 0.01)
    bv = jnp.zeros((1, 1), jnp.float32)

    # fused forward() + value_function()
    logits, value = altr_policy_forward(
        obs, w_embed, wl, bl, w1, b1, w2, b2, wv, bv)
    jax.block_until_ready((logits, value))

    # sanity check against plain-JAX reference
    ref_logits, ref_value = _reference(
        obs, w_embed, wl, bl, w1, b1, w2, b2, wv, bv)
    assert jnp.allclose(logits, ref_logits, atol=1e-5), "logits mismatch"
    assert jnp.allclose(value, ref_value, atol=1e-5), "value mismatch"
    assert logits.shape == (B, NOUT) and value.shape == (B,)

    print("KERNEL_OK")
</pallas_src>

<mosaic_0001>
module attributes {stable_mosaic.version = 11 : i64} {
  func.func @_fused_forward_kernel(%arg0: i32, %arg1: memref<8x32xf32, #tpu.memory_space<vmem>>, %arg2: memref<32x64xf32, #tpu.memory_space<vmem>>, %arg3: memref<2x32xf32, #tpu.memory_space<vmem>>, %arg4: memref<32x32xf32, #tpu.memory_space<vmem>>, %arg5: memref<32x128xf32, #tpu.memory_space<vmem>>, %arg6: memref<1x128xf32, #tpu.memory_space<vmem>>, %arg7: memref<1x32xf32, #tpu.memory_space<vmem>>, %arg8: memref<8x128xf32, #tpu.memory_space<vmem>>) attributes {dimension_semantics = [#tpu.dimension_semantics<parallel>], iteration_bounds = array<i64: 1>, scalar_prefetch = 0 : i64, scratch_operands = 0 : i64, tpu.core_type = #tpu.core_type<tc>, window_params = [{transform_indices = @transform_0, window_bounds = array<i64: 8, 32>}, {pipeline_mode = #tpu.pipeline_mode<synchronous>, transform_indices = @transform_1, window_bounds = array<i64: 32, 64>}, {pipeline_mode = #tpu.pipeline_mode<synchronous>, transform_indices = @transform_2, window_bounds = array<i64: 2, 32>}, {pipeline_mode = #tpu.pipeline_mode<synchronous>, transform_indices = @transform_3, window_bounds = array<i64: 32, 32>}, {pipeline_mode = #tpu.pipeline_mode<synchronous>, transform_indices = @transform_4, window_bounds = array<i64: 32, 128>}, {pipeline_mode = #tpu.pipeline_mode<synchronous>, transform_indices = @transform_5, window_bounds = array<i64: 1, 128>}, {pipeline_mode = #tpu.pipeline_mode<synchronous>, transform_indices = @transform_6, window_bounds = array<i64: 1, 32>}, {transform_indices = @transform_7, window_bounds = array<i64: 8, 128>}]} {
    %c0 = arith.constant 0 : index
    %c0_0 = arith.constant 0 : index
    %0 = vector.load %arg1[%c0, %c0_0] : memref<8x32xf32, #tpu.memory_space<vmem>>, vector<8x32xf32>
    %c0_1 = arith.constant 0 : index
    %c0_2 = arith.constant 0 : index
    %1 = vector.load %arg2[%c0_1, %c0_2] : memref<32x64xf32, #tpu.memory_space<vmem>>, vector<32x64xf32>
    %cst = arith.constant dense<0.000000e+00> : vector<8x64xf32>
    %2 = tpu.matmul %0, %1, %cst {dimension_numbers = #tpu.dot_dimension_numbers<[1], [0], [0], [1], [0, 0, 1, 1], [], []>} : vector<8x32xf32>, vector<32x64xf32>, vector<8x64xf32> -> vector<8x64xf32>
    %3 = vector.extract_strided_slice %2 {offsets = [0, 0], sizes = [8, 32], strides = [1, 1]} : vector<8x64xf32> to vector<8x32xf32>
    %4 = vector.extract_strided_slice %2 {offsets = [0, 32], sizes = [8, 32], strides = [1, 1]} : vector<8x64xf32> to vector<8x32xf32>
    %cst_3 = arith.constant dense<0xFF800000> : vector<8xf32>
    %5 = vector.multi_reduction <maximumf>, %3, %cst_3 [1] : vector<8x32xf32> to vector<8xf32>
    %6 = vector.shape_cast %5 : vector<8xf32> to vector<8x1xf32>
    %7 = vector.broadcast %6 : vector<8x1xf32> to vector<8x32xf32>
    %8 = arith.subf %3, %7 : vector<8x32xf32>
    %9 = math.exp %8 : vector<8x32xf32>
    %cst_4 = arith.constant dense<0.000000e+00> : vector<8xf32>
    %10 = vector.multi_reduction <add>, %9, %cst_4 [1] : vector<8x32xf32> to vector<8xf32>
    %11 = vector.shape_cast %10 : vector<8xf32> to vector<8x1xf32>
    %12 = math.log %11 : vector<8x1xf32>
    %13 = arith.addf %12, %6 : vector<8x1xf32>
    %14 = vector.broadcast %13 : vector<8x1xf32> to vector<8x32xf32>
    %15 = arith.subf %3, %14 : vector<8x32xf32>
    %c0_5 = arith.constant 0 : index
    %c0_6 = arith.constant 0 : index
    %16 = vector.load %arg3[%c0_5, %c0_6] : memref<2x32xf32, #tpu.memory_space<vmem>>, vector<1x32xf32>
    %17 = vector.broadcast %16 : vector<1x32xf32> to vector<8x32xf32>
    %18 = arith.addf %4, %17 : vector<8x32xf32>
    %19 = math.tanh %18 : vector<8x32xf32>
    %c0_7 = arith.constant 0 : index
    %c0_8 = arith.constant 0 : index
    %20 = vector.load %arg4[%c0_7, %c0_8] : memref<32x32xf32, #tpu.memory_space<vmem>>, vector<32x32xf32>
    %cst_9 = arith.constant dense<0.000000e+00> : vector<8x32xf32>
    %21 = tpu.matmul %19, %20, %cst_9 {dimension_numbers = #tpu.dot_dimension_numbers<[1], [0], [0], [1], [0, 0, 1, 1], [], []>} : vector<8x32xf32>, vector<32x32xf32>, vector<8x32xf32> -> vector<8x32xf32>
    %c1 = arith.constant 1 : index
    %c0_10 = arith.constant 0 : index
    %22 = vector.load %arg3[%c1, %c0_10] : memref<2x32xf32, #tpu.memory_space<vmem>>, vector<1x32xf32>
    %23 = vector.broadcast %22 : vector<1x32xf32> to vector<8x32xf32>
    %24 = arith.addf %21, %23 : vector<8x32xf32>
    %25 = math.tanh %24 : vector<8x32xf32>
    %c0_11 = arith.constant 0 : index
    %c0_12 = arith.constant 0 : index
    %26 = vector.load %arg7[%c0_11, %c0_12] : memref<1x32xf32, #tpu.memory_space<vmem>>, vector<1x32xf32>
    %27 = vector.broadcast %26 : vector<1x32xf32> to vector<8x32xf32>
    %28 = arith.mulf %25, %27 : vector<8x32xf32>
    %cst_13 = arith.constant dense<0.000000e+00> : vector<8xf32>
    %29 = vector.multi_reduction <add>, %28, %cst_13 [1] : vector<8x32xf32> to vector<8xf32>
    %30 = vector.shape_cast %29 : vector<8xf32> to vector<8x1xf32>
    %c0_14 = arith.constant 0 : index
    %c0_15 = arith.constant 0 : index
    %31 = vector.load %arg5[%c0_14, %c0_15] : memref<32x128xf32, #tpu.memory_space<vmem>>, vector<32x128xf32>
    %cst_16 = arith.constant dense<0.000000e+00> : vector<8x128xf32>
    %32 = tpu.matmul %15, %31, %cst_16 {dimension_numbers = #tpu.dot_dimension_numbers<[1], [0], [0], [1], [0, 0, 1, 1], [], []>} : vector<8x32xf32>, vector<32x128xf32>, vector<8x128xf32> -> vector<8x128xf32>
    %c0_17 = arith.constant 0 : index
    %c0_18 = arith.constant 0 : index
    %33 = vector.load %arg6[%c0_17, %c0_18] : memref<1x128xf32, #tpu.memory_space<vmem>>, vector<1x128xf32>
    %34 = vector.broadcast %33 : vector<1x128xf32> to vector<8x128xf32>
    %35 = arith.addf %32, %34 : vector<8x128xf32>
    %36 = tpu.iota {dimensions = array<i32: 1>} : vector<8x128xi32>
    %c15_i32 = arith.constant 15 : i32
    %37 = vector.broadcast %c15_i32 : i32 to vector<8x128xi32>
    %38 = arith.cmpi eq, %36, %37 : vector<8x128xi32>
    %cst_19 = arith.constant 0.000000e+00 : f32
    %39 = vector.shape_cast %30 : vector<8x1xf32> to vector<8x1xf32>
    %40 = vector.broadcast %39 : vector<8x1xf32> to vector<8x128xf32>
    %41 = vector.broadcast %cst_19 : f32 to vector<8x128xf32>
    %42 = arith.select %38, %40, %41 : vector<8x128xi1>, vector<8x128xf32>
    %43 = arith.addf %35, %42 : vector<8x128xf32>
    %c0_20 = arith.constant 0 : index
    %c0_21 = arith.constant 0 : index
    %44 = vector.load %arg8[%c0_20, %c0_21] : memref<8x128xf32, #tpu.memory_space<vmem>>, vector<8x128xf32>
    tpu.vector_store %arg8[%c0_20, %c0_21], %43 {strides = array<i32>} : memref<8x128xf32, #tpu.memory_space<vmem>>, vector<8x128xf32>,
    return
  }
  func.func @transform_0(%arg0: i32) -> (i32, i32) {
    %c0_i32 = arith.constant 0 : i32
    %c0_i32_0 = arith.constant 0 : i32
    return %arg0, %c0_i32 : i32, i32
  }
  func.func @transform_1(%arg0: i32) -> (i32, i32) {
    %c0_i32 = arith.constant 0 : i32
    %c0_i32_0 = arith.constant 0 : i32
    %c0_i32_1 = arith.constant 0 : i32
    return %c0_i32, %c0_i32_0 : i32, i32
  }
  func.func @transform_2(%arg0: i32) -> (i32, i32) {
    %c0_i32 = arith.constant 0 : i32
    %c0_i32_0 = arith.constant 0 : i32
    %c0_i32_1 = arith.constant 0 : i32
    return %c0_i32, %c0_i32_0 : i32, i32
  }
  func.func @transform_3(%arg0: i32) -> (i32, i32) {
    %c0_i32 = arith.constant 0 : i32
    %c0_i32_0 = arith.constant 0 : i32
    %c0_i32_1 = arith.constant 0 : i32
    return %c0_i32, %c0_i32_0 : i32, i32
  }
  func.func @transform_4(%arg0: i32) -> (i32, i32) {
    %c0_i32 = arith.constant 0 : i32
    %c0_i32_0 = arith.constant 0 : i32
    %c0_i32_1 = arith.constant 0 : i32
    return %c0_i32, %c0_i32_0 : i32, i32
  }
  func.func @transform_5(%arg0: i32) -> (i32, i32) {
    %c0_i32 = arith.constant 0 : i32
    %c0_i32_0 = arith.constant 0 : i32
    %c0_i32_1 = arith.constant 0 : i32
    return %c0_i32, %c0_i32_0 : i32, i32
  }
  func.func @transform_6(%arg0: i32) -> (i32, i32) {
    %c0_i32 = arith.constant 0 : i32
    %c0_i32_0 = arith.constant 0 : i32
    %c0_i32_1 = arith.constant 0 : i32
    return %c0_i32, %c0_i32_0 : i32, i32
  }
  func.func @transform_7(%arg0: i32) -> (i32, i32) {
    %c0_i32 = arith.constant 0 : i32
    %c0_i32_0 = arith.constant 0 : i32
    return %arg0, %c0_i32 : i32, i32
  }
}

</mosaic_0001>

<bundles_post_ra>
// kernel: tpu_custom_call.1
= control target key start
LH: loop header
LB: loop body
LE: loop exit
PB: predicated region body
PF: predicated region fallthrough
CT: control target
= control target key end

     0   :  { %12 = vsyncpa [#allocation3], 0  ;;  %s739_s0 = inlined_call_operand.hbm [shape: f32[8,32], index: 0, kind: input, shape index: {}]   ;;  %s740_s1 = inlined_call_operand.hbm [shape: f32[32,64], index: 1, kind: input, shape index: {}]   ;;  %s741_s2 = inlined_call_operand.vmem [shape: f32[2,32], index: 2, kind: input, shape index: {}]   ;;  %s742_s3 = inlined_call_operand.hbm [shape: f32[32,32], index: 3, kind: input, shape index: {}]   ;;  %s743_s4 = inlined_call_operand.hbm [shape: f32[32,128], index: 4, kind: input, shape index: {}]   ;;  %s744_s5 = inlined_call_operand.vmem [shape: f32[1,128], index: 5, kind: input, shape index: {}]   ;;  %s745_s6 = inlined_call_operand.vmem [shape: f32[1,32], index: 6, kind: input, shape index: {}]   ;;  %s746_s7 = inlined_call_operand.hbm [shape: f32[8,128], index: 7, kind: output, shape index: {}]  }
   0x1   :  { %13 = vsyncpa [#allocation6], 0 }
   0x2   :  { %14 = vsyncpa [#allocation9], 0 }
   0x3   :  { %15 = vsyncpa [#allocation4], 0  ;;  %s597_s24 = smov [#allocation5]   ;;  %s479_s28 = scalar_lea.hbm %s740_s1, 512 }
   0x4   :  { %s31_s25 = sshll.u32 %s597_s24, 4  ;;  %p480_p0 = scmp.ne.s32.totalorder %s740_s1, %s479_s28  ;;  %s32_s25 = int_to_ptr.vmem [resolvable:$true] %s31_s25 }
   0x5   :  { %p483_p1 = scmp.lt.u32.totalorder %s479_s28, %s740_s1 }
   0x7   :  { %p485_p2 = pnand %p483_p1, %p480_p0 }
   0x9   :  { %488 = shalt.err (!%p485_p2)
}
   0xa   :  { %s489_s10 = scalar_lea.vmem %s32_s25, 512  ;;  %p494_p4 = scmp.lt.s32.totalorder %s32_s25, %s32_s25 }
   0xb   :  { %p490_p3 = scmp.ne.s32.totalorder %s32_s25, %s489_s10  ;;  %p495_p5 = scmp.lt.s32.totalorder %s489_s10, %s489_s10 }
   0xd   :  { %p496_p6 = por %p495_p5, %p494_p4 }
   0xf   :  { %p497_p7 = pnand %p496_p6, %p490_p3 }
  0x11   :  { %500 = shalt.err (!%p497_p7)
}
  0x12   :  { %s598_s11 = smov 128   ;;  %s599_s12 = smov 8  }
  0x13   :  { %37 = dma.hbm_to_vmem [thread:$0]  %s740_s1, 512, %s32_s25, [#allocation6], %s598_s11, %s598_s11, %s599_s12  }
  0x14   :  { %s600_s15 = smov [#allocation2]   ;;  %s601_s17 = smov [#allocation7]  }
  0x15   :  { %s22_s16 = sshll.u32 %s600_s15, 4  ;;  %s45_s18 = sshll.u32 %s601_s17, 4  ;;  %s23_s16 = int_to_ptr.vmem [resolvable:$true] %s22_s16  ;;  %s46_s18 = int_to_ptr.vmem [resolvable:$true] %s45_s18 }
  0x16   :  { %s501_s21 = scalar_lea.hbm %s739_s0, 128 }
  0x17   :  { %p502_p8 = scmp.ne.s32.totalorder %s739_s0, %s501_s21  ;;  %p505_p9 = scmp.lt.u32.totalorder %s501_s21, %s739_s0 }
  0x19   :  { %p507_p10 = pnand %p505_p9, %p502_p8 }
  0x1b   :  { %510 = shalt.err (!%p507_p10)
}
  0x1c   :  { %s511_s1 = scalar_lea.vmem %s23_s16, 128  ;;  %p516_p12 = scmp.lt.s32.totalorder %s23_s16, %s23_s16 }
  0x1d   :  { %p512_p11 = scmp.ne.s32.totalorder %s23_s16, %s511_s1  ;;  %p517_p13 = scmp.lt.s32.totalorder %s511_s1, %s511_s1 }
  0x1f   :  { %p518_p0 = por %p517_p13, %p516_p12 }
  0x21   :  { %p519_p1 = pnand %p518_p0, %p512_p11 }
  0x23   :  { %522 = shalt.err (!%p519_p1)
}
  0x24   :  { %25 = dma.hbm_to_vmem [thread:$0]  %s739_s0, 128, %s23_s16, [#allocation3]  }
  0x25   :  { %s523_s30 = scalar_lea.hbm %s742_s3, 512 }
  0x26   :  { %p524_p2 = scmp.ne.s32.totalorder %s742_s3, %s523_s30  ;;  %p527_p3 = scmp.lt.u32.totalorder %s523_s30, %s742_s3 }
  0x28   :  { %p529_p4 = pnand %p527_p3, %p524_p2 }
  0x2a   :  { %532 = shalt.err (!%p529_p4)
}
  0x2b   :  { %s533_s14 = scalar_lea.vmem %s46_s18, 512  ;;  %p538_p6 = scmp.lt.s32.totalorder %s46_s18, %s46_s18 }
  0x2c   :  { %p534_p5 = scmp.ne.s32.totalorder %s46_s18, %s533_s14  ;;  %p539_p7 = scmp.lt.s32.totalorder %s533_s14, %s533_s14 }
  0x2e   :  { %p540_p8 = por %p539_p7, %p538_p6 }
  0x30   :  { %p541_p9 = pnand %p540_p8, %p534_p5 }
  0x32   :  { %544 = shalt.err (!%p541_p9)
}
  0x33   :  { %51 = dma.hbm_to_vmem [thread:$0]  %s742_s3, 512, %s46_s18, [#allocation6], %s598_s11, %s598_s11, %s599_s12  }
  0x34   :  { %s602_s16 = smov [#allocation8]   ;;  %s545_s21 = scalar_lea.hbm %s743_s4, 512 }
  0x35   :  { %s57_s17 = sshll.u32 %s602_s16, 4  ;;  %p546_p10 = scmp.ne.s32.totalorder %s743_s4, %s545_s21  ;;  %s58_s17 = int_to_ptr.vmem [resolvable:$true] %s57_s17 }
  0x36   :  { %p549_p11 = scmp.lt.u32.totalorder %s545_s21, %s743_s4 }
  0x38   :  { %p551_p12 = pnand %p549_p11, %p546_p10 }
  0x3a   :  { %554 = shalt.err (!%p551_p12)
}
  0x3b   :  { %s555_s1 = scalar_lea.vmem %s58_s17, 512  ;;  %p560_p0 = scmp.lt.s32.totalorder %s58_s17, %s58_s17 }
  0x3c   :  { %p556_p13 = scmp.ne.s32.totalorder %s58_s17, %s555_s1  ;;  %p561_p1 = scmp.lt.s32.totalorder %s555_s1, %s555_s1 }
  0x3e   :  { %p562_p2 = por %p561_p1, %p560_p0 }
  0x40   :  { %p563_p3 = pnand %p562_p2, %p556_p13 }
  0x42   :  { %566 = shalt.err (!%p563_p3)
}
  0x43   :  { %63 = dma.hbm_to_vmem [thread:$0]  %s743_s4, 512, %s58_s17, [#allocation9], %s598_s11, %s598_s11, %s599_s12  }
  0x44   :  { %589 = dma.done.wait [#allocation3], 128  }
  0x45   :  { %590 = vsyncadd [#allocation3], 4294967168 }
  0x46   :  { %591 = dma.done.wait [#allocation6], 1024  }
  0x47   :  { %592 = vsyncadd [#allocation6], 4294966272 }
  0x48   :  { %593 = dma.done.wait [#allocation9], 512  }
  0x49   :  { %594 = vsyncadd [#allocation9], 4294966784  ;;  %v603_v0 = vmov 0.0|0.0   ;;  %vm604_vm0 = vmmov 0   ;;  %v605_v1 = vmov 0.0   ;;  %v81_v2 = vld [vmem:[#allocation5] sm:$0xff]  ;;  %v363_v47 = vlaneseq }
  0x4a   :  { %441 = vmatprep.subr.bf16.mxu0 %v603_v0  ;;  %416 = vmatprep.mubr.msk.f32.mxu0 %vm604_vm0, %v605_v1  ;;  %v82_v3 = vld [vmem:[#allocation5 + $0x8] sm:$0xff]  ;;  %v83_v4 = vld [vmem:[#allocation5 + $0x10] sm:$0xff]  ;;  %v84_v6 = vld [vmem:[#allocation5 + $0x18] sm:$0xff]  ;;  %s606_s12 = smov 32   ;;  %vm85_vm1 = vcmask 261120   ;;  %s607_s25 = smov 96  }
  0x4b   :  { %447 = vmatprep.subr.bf16.mxu1 %v603_v0  ;;  %427 = vmatprep.mubr.msk.f32.mxu1 %vm604_vm0, %v605_v1  ;;  %v442_v5 = vpack.c.bf16 %v82_v3, %v81_v2  ;;  %v387_v7 = vld [vmem:[%s741_s2] ss:$0 sm:$0xff]  ;;  %v445_v8 = vpack.c.bf16 %v84_v6, %v83_v4  ;;  %v183_v10 = vld [vmem:[#allocation7] sm:$0xff]  ;;  %v184_v11 = vld [vmem:[#allocation7 + $0x8] sm:$0xff]  ;;  %v364_v48 = vand.u32 127, %v363_v47 }
  0x4c   :  { %178 = vrot.lane.b32.xlu0 %v387_v7, %s606_s12  ;;  %v80_v9 = vld [vmem:[#allocation2] sm:$0xff]  ;;  %v185_v12 = vld [vmem:[#allocation7 + $0x10] sm:$0xff]  ;;  %v448_v13 = vpack.c.bf16 %v184_v11, %v183_v10  ;;  %v279_v28 = vld [vmem:[#allocation8] sm:$0xff] }
  0x4d   :  { %443 = vmatpush3.bf16.msra.mxu0 %v442_v5  ;;  %v186_v14 = vld [vmem:[#allocation7 + $0x18] sm:$0xff]  ;;  %v280_v29 = vld [vmem:[#allocation8 + $0x8] sm:$0xff]  ;;  %v281_v31 = vld [vmem:[#allocation8 + $0x10] sm:$0xff]  ;;  %vm365_vm2 = vcmp.eq.s32.totalorder %v364_v48, 15 }
  0x4e   :  { %444 = vmatprep.subr.bf16.mxu0 %v603_v0  ;;  %449 = vmatpush3.bf16.msra.mxu1 %v448_v13  ;;  %v451_v15 = vpack.c.bf16 %v186_v14, %v185_v12  ;;  %v454_v30 = vpack.c.bf16 %v280_v29, %v279_v28  ;;  %v282_v32 = vld [vmem:[#allocation8 + $0x18] sm:$0xff] }
  0x4f   :  { %450 = vmatprep.subr.bf16.mxu1 %v603_v0  ;;  %v457_v33 = vpack.c.bf16 %v282_v32, %v281_v31  ;;  %v388_v39 = vld [vmem:[%s741_s2 + $0x1] ss:$0 sm:$0xff]  ;;  %v390_v43 = vld [vmem:[%s745_s6] ss:$0 sm:$0xff]  ;;  %s608_s2 = smov [#allocation10]  }
  0x50   :  { %v391_v49 = vld [vmem:[%s744_s5] ss:$0 sm:$0xff]  ;;  %s375_s10 = sshll.u32 %s608_s2, 4  ;;  %s376_s10 = int_to_ptr.vmem [resolvable:$true] %s375_s10 }
  0x51   :  { %446 = vmatpush3.bf16.msra.mxu0 %v445_v8  ;;  %s567_s6 = scalar_lea.vmem %s376_s10, 128  ;;  %p572_p5 = scmp.lt.s32.totalorder %s376_s10, %s376_s10 }
  0x52   :  { %453 = vmatprep.subr.bf16.mxu0 %v603_v0  ;;  %452 = vmatpush3.bf16.msra.mxu1 %v451_v15  ;;  %p568_p4 = scmp.ne.s32.totalorder %s376_s10, %s567_s6  ;;  %p573_p6 = scmp.lt.s32.totalorder %s567_s6, %s567_s6 }
  0x54   :  { %417 = vmatmul.mubr.msk.f32.vlgmr.msra.gmra.mrb[0].mxu0 %vm85_vm1, %v80_v9  ;;  %p574_p7 = por %p573_p6, %p572_p5 }
  0x55   :  { %438 = vmatprep.mubr.msk.f32.mxu0 %vm604_vm0, %v605_v1  ;;  %455 = vmatpush3.bf16.msra.mxu0 %v454_v30 }
  0x56   :  { %456 = vmatprep.subr.bf16.mxu0 %v603_v0  ;;  %p575_p8 = pnand %p574_p7, %p568_p4 }
  0x59   :  { %458 = vmatpush3.bf16.msra.mxu0 %v457_v33 }
  0xbe   :  { %v179_v16 = vpop.permute.xlu0 %178 }
 0x127   :  { %v155_v17 = vpop.f32.mrb[0].mxu0 }
 0x128   :  { %v181_v18 = vadd.f32 %v179_v16, %v155_v17  ;;  %v418_v19 = vpop.f32.mrb[1].mxu0  ;;  %v159_v20 = vsel %vm85_vm1, %v155_v17, -inf }
 0x129   :  { %160 = vmax.xlane.f32.xlu0 %v159_v20 }
 0x12a   :  { %471 = vtanh.f32 %v181_v18 }
 0x134   :  { %v472_v21 = vpop.eup %471 }
 0x135   :  { %193 = vrot.lane.b32.xlu1 %v472_v21, %s607_s25 }
 0x1a7   :  { %v194_v22 = vpop.permute.xlu1 %193 }
 0x1a8   :  { %428 = vmatmul.mubr.msk.f32.vlgmr.msra.gmra.mrb[0].mxu1 %vm85_vm1, %v194_v22 }
 0x1b6   :  { %v161_v23 = vpop.xlane.xlu0 %160 }
 0x1b7   :  { %v162_v24 = vsub.f32 %v155_v17, %v161_v23 }
 0x1b9   :  { %v163_v25 = vmul.f32 1.442695, %v162_v24 }
 0x1bb   :  { %473 = vpow2.f32 %v163_v25 }
 0x1c5   :  { %v474_v26 = vpop.eup %473 }
 0x1c6   :  { %v165_v27 = vsel %vm85_vm1, %v474_v26, 0.0 }
 0x1c7   :  { %166 = vadd.xlane.f32.xlu1 %v165_v27 }
 0x254   :  { %v167_v34 = vpop.xlane.xlu1 %166 }
 0x255   :  { %475 = vlog2.f32 %v167_v34 }
 0x25f   :  { %v476_v35 = vpop.eup %475 }
 0x260   :  { %v169_v36 = vmul.f32 0.6931472, %v476_v35 }
 0x262   :  { %v170_v37 = vadd.f32 %v169_v36, %v161_v23 }
 0x264   :  { %v171_v38 = vsub.f32 %v155_v17, %v170_v37 }
 0x266   :  { %439 = vmatmul.mubr.msk.f32.vlgmr.msra.gmra.mrb[2].mxu0 %vm85_vm1, %v171_v38 }
 0x27b   :  { %v263_v40 = vpop.f32.mrb[0].mxu1 }
 0x27c   :  { %v264_v41 = vadd.f32 %v388_v39, %v263_v40  ;;  %v429_v42 = vpop.f32.mrb[1].mxu1 }
 0x27e   :  { %477 = vtanh.f32 %v264_v41 }
 0x288   :  { %v478_v44 = vpop.eup %477 }
 0x289   :  { %v275_v45 = vmul.f32 %v478_v44, %v390_v43 }
 0x28b   :  { %v276_v46 = vsel %vm85_vm1, %v275_v45, 0.0 }
 0x28c   :  { %277 = vadd.xlane.f32.xlu0 %v276_v46 }
 0x319   :  { %v278_v50 = vpop.xlane.xlu0 %277 }
 0x31a   :  { %v366_v54 = vsel %vm365_vm2, %v278_v50, 0.0 }
 0x339   :  { %v359_v51 = vpop.f32.mrb[2].mxu0 }
 0x33a   :  { %v360_v52 = vadd.f32 %v391_v49, %v359_v51  ;;  %v440_v53 = vpop.f32.mrb[3].mxu0 }
 0x33c   :  { %v367_v55 = vadd.f32 %v366_v54, %v360_v52 }
 0x33e   :  { %368 = vst [vmem:[#allocation10] sm:$0xff] %v367_v55 }
 0x33f   :  { %578 = shalt.err (!%p575_p8)
}
 0x340   :  { %s579_s14 = scalar_lea.hbm %s746_s7, 128 }
 0x341   :  { %p580_p9 = scmp.ne.s32.totalorder %s746_s7, %s579_s14  ;;  %p583_p10 = scmp.lt.u32.totalorder %s579_s14, %s746_s7 }
 0x343   :  { %p585_p11 = pnand %p583_p10, %p580_p9 }
 0x345   :  { %588 = shalt.err (!%p585_p11)
}
 0x346   :  { %378 = dma.vmem_to_hbm [thread:$0]  %s376_s10, 128, %s746_s7, [#allocation4]  }
 0x347   :  { %595 = dma.done.wait [#allocation4], 128  }
 0x348   :  { %596 = vsyncadd [#allocation4], 4294967168 }
 0x349   :  { %382 = vsyncpa [#allocation3], 1 }
 0x34a   :  { %383 = vsyncpa [#allocation6], 1 }
 0x34b   :  { %384 = vsyncpa [#allocation9], 1 }
 0x34c   :  { %385 = vsyncpa [#allocation4], 1 }

</bundles_post_ra>
